<compile_context>
chip_gen: v6e
topology: v6e:2x2x1
jax: 0.10.0
libtpu: 0.0.40
codegen_flags: <defaults>
</compile_context>

<pallas_src>
import functools

import jax
import jax.numpy as jnp
from jax import lax
from jax.experimental import pallas as pl
from jax.experimental.pallas import tpu as pltpu


# ----------------------------------------------------------------------------
# Chip introspection helpers (defensive: fall back to conservative defaults).
# ----------------------------------------------------------------------------
def _device_kind():
    try:
        return jax.devices()[0].device_kind.lower()
    except Exception:
        return ""


def _vmem_cap_bytes():
    """Usable VMEM budget for this kernel: physical capacity minus headroom."""
    try:
        phys = int(pltpu.get_tpu_info().vmem_capacity_bytes)
    except Exception:
        phys = 64 << 20            # conservative: v7x per-TensorCore VMEM
    return max(16 << 20, (phys * 3) // 4)


def _default_fuse_threshold():
    kind = _device_kind()
    if "v6" in kind or "v7" in kind:
        return 256                 # 2x256^2 MXU: the stacked Gram pads to one tile
    return 128                     # v5e (4x128^2) and unknown chips


def _default_nsplit():
    # v7x has 2 TensorCores per chip; split the CD reduction across them.
    return 2 if "v7" in _device_kind() else 1


# ----------------------------------------------------------------------------
# Pallas kernel: tiled, fused masked-Gram accumulation (partial sums only).
# ----------------------------------------------------------------------------
def _style_gram_kernel(fused, x_ref, m_ref, g_ref, acc_ref):
    k = pl.program_id(1)           # CD reduction axis (last grid axis)

    @pl.when(k == 0)
    def _init():
        acc_ref[...] = jnp.zeros_like(acc_ref)

    x = x_ref[...]                 # (AB, TK) feature tile (f32 or bf16)
    m_bright = m_ref[0:1, :]       # (1, TK) {0,1} map, broadcast over AB
    m_pooled = m_ref[1:2, :]

    # Mask algebra assumes bright <= pooled and background = ~pooled, which is
    # exactly what StyleLoss.creat_mask produces (pooled = maxpool(bright)).
    f_bright = x * m_bright        # masked_fill(~bright_mask, 0)
    f_pooled = x * m_pooled
    f_blooming = f_pooled - f_bright     # blooming mask == pooled & ~bright
    f_background = x - f_pooled          # background mask == ~pooled

    def gram(lhs, rhs):
        # lhs @ rhs.T without materializing a transpose: contract lane axes.
        return lax.dot_general(lhs, rhs, (((1,), (1,)), ((), ())),
                               preferred_element_type=jnp.float32)

    if fused:
        # One MXU pass over the CD tile for all three masked Grams.
        f = jnp.concatenate([f_bright, f_blooming, f_background], axis=0)
        acc_ref[...] += gram(f, f)                     # (3*AB, 3*AB)
    else:
        acc_ref[0, :, :] = acc_ref[0, :, :] + gram(f_bright, f_bright)
        acc_ref[1, :, :] = acc_ref[1, :, :] + gram(f_blooming, f_blooming)
        acc_ref[2, :, :] = acc_ref[2, :, :] + gram(f_background, f_background)

    @pl.when(k == pl.num_programs(1) - 1)
    def _finalize():
        g_ref[...] = acc_ref[...]  # raw partial Gram; scaling + MSE done in XLA


def _pick_tk(cd, ab, nsplit, itemsize, target_tile_bytes, max_tk):
    """Lane-tile width: a multiple of 128 sized so one (AB, TK) buffer is
    roughly `target_tile_bytes` (fewer, fatter grid steps amortize the
    ~0.35 us per-step overhead)."""
    max_tk = max(128, (max_tk // 128) * 128)
    tk = target_tile_bytes // max(ab * itemsize, 1)
    tk = max(128, min((tk // 128) * 128, max_tk))
    per_split = -(-cd // nsplit)                    # ceil(cd / nsplit)
    per_split = max(128, -(-per_split // 128) * 128)  # round up to lane width
    return min(tk, per_split)


def style_loss_pallas(x, bright_mask, blooming_mask, background_mask,
                      bright_target, blooming_target, bg_target, weight,
                      *, use_bf16_mxu=False, nsplit=None, fuse_threshold=None,
                      max_tk=8192, target_tile_bytes=4 << 20):
    """Returns (output, (bright_G, blooming_G, background_G), losses[4])."""
    a, b, c, d = x.shape
    ab, cd = a * b, c * d

    compute_dtype = jnp.bfloat16 if use_bf16_mxu else jnp.float32
    itemsize = jnp.dtype(compute_dtype).itemsize

    if nsplit is None:
        nsplit = _default_nsplit()
    if fuse_threshold is None:
        fuse_threshold = _default_fuse_threshold()

    # Feature stream cast in the wrapper (bf16 halves HBM bytes when enabled);
    # the in-kernel accumulator is always f32.
    x_flat = x.reshape(ab, cd).astype(compute_dtype)

    # creat_mask repeats one (1, 1, H, W) spatial map across channels and
    # masked_fill broadcasts it over batch, so only the spatial map is shipped:
    # row 0 = bright, row 1 = pooled (= bright | blooming).
    bright_sp = bright_mask[0, 0].reshape(1, cd)
    pooled_sp = jnp.logical_or(bright_mask[0, 0],
                               blooming_mask[0, 0]).reshape(1, cd)
    masks2 = jnp.concatenate([bright_sp, pooled_sp], axis=0).astype(compute_dtype)

    # Tile the CD reduction: TK a 128-multiple, CD zero-padded so each parallel
    # split gets an integer number of tiles (zero columns add nothing to G).
    tk = _pick_tk(cd, ab, nsplit, itemsize, target_tile_bytes, max_tk)
    padded_cd = -(-cd // (tk * nsplit)) * (tk * nsplit)
    if padded_cd != cd:
        pad = padded_cd - cd
        x_flat = jnp.pad(x_flat, ((0, 0), (0, pad)))
        masks2 = jnp.pad(masks2, ((0, 0), (0, pad)))
    num_k = padded_cd // tk
    kps = num_k // nsplit          # reduction steps per parallel split

    fused = (3 * ab) <= fuse_threshold
    acc_shape = (3 * ab, 3 * ab) if fused else (3, ab, ab)
    acc_elems = 9 * ab * ab if fused else 3 * ab * ab

    # VMEM budget: double-buffered input tiles + output block + scratch +
    # in-kernel temporaries; clamped to the chip's physical VMEM w/ headroom.
    vmem_bytes = (2 * (ab + 2) * tk * itemsize     # x + mask tiles (2-deep)
                  + 2 * acc_elems * 4              # partial-Gram output block
                  + acc_elems * 4                  # accumulator scratch
                  + 7 * ab * tk * itemsize)        # masked temps + fused stack
    vmem_limit = int(min(max(2 * vmem_bytes, 32 << 20), _vmem_cap_bytes()))

    kernel = functools.partial(_style_gram_kernel, fused)

    x_spec = pl.BlockSpec((ab, tk), lambda s, k: (0, s * kps + k))
    m_spec = pl.BlockSpec((2, tk), lambda s, k: (0, s * kps + k))
    g_spec = pl.BlockSpec((None,) + acc_shape,
                          lambda s, k: (s,) + (0,) * len(acc_shape))

    g_parts = pl.pallas_call(
        kernel,
        grid=(nsplit, kps),
        in_specs=[x_spec, m_spec],
        out_specs=g_spec,
        out_shape=jax.ShapeDtypeStruct((nsplit,) + acc_shape, jnp.float32),
        scratch_shapes=[pltpu.VMEM(acc_shape, jnp.float32)],
        compiler_params=pltpu.CompilerParams(
            dimension_semantics=("parallel", "arbitrary"),
            vmem_limit_bytes=vmem_limit),
    )(x_flat, masks2)

    # Epilogue in XLA on tiny (AB, AB) arrays: fold split partials, scale
    # (G.div(a*b*c*d) then G.mul_(weight)), slice per-mask Grams, MSE losses.
    g_sum = jnp.sum(g_parts, axis=0)
    scale = float(weight) / float(ab * cd)
    if fused:
        gb = g_sum[0 * ab:1 * ab, 0 * ab:1 * ab] * scale
        gl = g_sum[1 * ab:2 * ab, 1 * ab:2 * ab] * scale
        gg = g_sum[2 * ab:3 * ab, 2 * ab:3 * ab] * scale
    else:
        gb = g_sum[0] * scale
        gl = g_sum[1] * scale
        gg = g_sum[2] * scale

    lb = jnp.mean(jnp.square(gb - bright_target.astype(jnp.float32)))
    ll = jnp.mean(jnp.square(gl - blooming_target.astype(jnp.float32)))
    lg = jnp.mean(jnp.square(gg - bg_target.astype(jnp.float32)))
    losses = jnp.stack([lb, ll, lg, lb + ll + lg])   # [bright, blooming, bg, total]

    # StyleLoss.forward returns self.output = input.clone()
    return x, (gb, gl, gg), losses


# ----------------------------------------------------------------------------
# Mask construction (StyleLoss.creat_mask) -- plain JAX glue.
# TODO(synk): bilinear resize + 9x9 max-pool stay outside the Pallas kernel.
# ----------------------------------------------------------------------------
def create_mask(content_img, size, channel):
    # content_img: (1, 3, Hc, Wc) NCHW
    r, g, b = jnp.split(content_img, 3, axis=1)
    bright = r + g + b
    mean_bright = bright / 3.0
    # F.interpolate(..., size=[size, size], mode='bilinear')
    mean_bright = jax.image.resize(
        mean_bright, (mean_bright.shape[0], 1, size, size), method="bilinear")
    bright_mask1 = jnp.where(mean_bright <= 0, 0.0, 1.0)
    # nn.MaxPool2d(kernel_size=9, stride=1, padding=4)
    blooming_mask1 = lax.reduce_window(
        bright_mask1, -jnp.inf, lax.max,
        window_dimensions=(1, 1, 9, 9),
        window_strides=(1, 1, 1, 1),
        padding=((0, 0), (0, 0), (4, 4), (4, 4)))
    background_mask1 = -blooming_mask1 + 1.0
    blooming_mask1 = blooming_mask1 - bright_mask1

    def rep(m):  # cat along channel dim `channel` times
        return jnp.repeat(m.astype(jnp.bool_), channel, axis=1)

    return rep(bright_mask1), rep(blooming_mask1), rep(background_mask1)


# ----------------------------------------------------------------------------
# Pure-JAX reference for verification.
# ----------------------------------------------------------------------------
def gram_ref(feat):
    a, b, c, d = feat.shape
    f = feat.reshape(a * b, c * d)
    return (f @ f.T) / (a * b * c * d)


def style_loss_ref(x, masks, targets, weight):
    grams, losses = [], []
    for m, t in zip(masks, targets):
        xm = jnp.where(jnp.broadcast_to(m, x.shape), x, 0.0)
        g = gram_ref(xm) * weight
        grams.append(g)
        losses.append(jnp.mean((g - t) ** 2))
    return grams, losses


if __name__ == "__main__":
    import numpy as np

    key = jax.random.PRNGKey(0)
    weight = 1000.0

    def run_case(N, C, H, W, configs):
        k1, k2, k3, k4, k5 = jax.random.split(jax.random.fold_in(key, H), 5)
        x = jax.random.normal(k1, (N, C, H, W), dtype=jnp.float32)
        content_img = jax.random.normal(k2, (1, 3, 16, 16), dtype=jnp.float32)

        # Deterministic synthetic "precomputed" style grams (module __init__).
        bright_target = gram_ref(jax.random.normal(k3, (N, C, H, W), jnp.float32)) * weight
        blooming_target = gram_ref(jax.random.normal(k4, (N, C, H, W), jnp.float32)) * weight * 0.2
        bg_target = gram_ref(jax.random.normal(k5, (N, C, H, W), jnp.float32)) * weight * 0.1

        masks = create_mask(content_img, H, C)
        ref_grams, ref_losses = style_loss_ref(
            x, masks, (bright_target, blooming_target, bg_target), weight)
        ref_total = float(sum(ref_losses))

        for cfg in configs:
            output, grams, losses = style_loss_pallas(
                x, *masks, bright_target, blooming_target, bg_target, weight, **cfg)
            jax.block_until_ready((output, grams, losses))

            bf16 = cfg.get("use_bf16_mxu", False)
            g_rtol, g_atol = (5e-2, 0.5) if bf16 else (1e-3, 1e-2)
            l_rtol = 1e-1 if bf16 else 1e-3

            assert np.allclose(np.asarray(output), np.asarray(x))
            for g, rg in zip(grams, ref_grams):
                assert np.allclose(np.asarray(g), np.asarray(rg),
                                   rtol=g_rtol, atol=g_atol), cfg
            assert np.allclose(np.asarray(losses[:3]), np.asarray(ref_losses),
                               rtol=l_rtol, atol=1e-2), cfg
            assert np.allclose(float(losses[3]), ref_total,
                               rtol=l_rtol, atol=1e-2), cfg

    # 16x16: CD is already a multiple of 128 -> exercises single-step,
    # multi-step accumulation, 2-way split, non-fused, and bf16 paths.
    run_case(2, 4, 16, 16, [
        dict(),                     # defaults (auto nsplit / byte-targeted TK)
        dict(max_tk=128),           # multi-step CD accumulation in VMEM scratch
        dict(nsplit=2),             # 2-way reduction split (v7x 2-TC path)
        dict(fuse_threshold=1),     # non-fused 3-Gram path
        dict(use_bf16_mxu=True),    # bf16 feature streaming (f32 accumulate)
    ])

    # 20x20: CD=400 is not a multiple of 128 -> exercises the zero-padding path.
    run_case(2, 4, 20, 20, [dict(), dict(nsplit=2)])

    print("KERNEL_OK")
</pallas_src>

<mosaic_0001>
module attributes {stable_mosaic.version = 11 : i64} {
  func.func @_style_gram_kernel(%arg0: i32, %arg1: i32, %arg2: memref<8x256xf32, #tpu.memory_space<vmem>>, %arg3: memref<2x256xf32, #tpu.memory_space<vmem>>, %arg4: memref<1x24x24xf32, #tpu.memory_space<vmem>>, %arg5: memref<24x24xf32, #tpu.memory_space<vmem>>) attributes {dimension_semantics = [#tpu.dimension_semantics<parallel>, #tpu.dimension_semantics<arbitrary>], iteration_bounds = array<i64: 1, 1>, scalar_prefetch = 0 : i64, scratch_operands = 1 : i64, tpu.core_type = #tpu.core_type<tc>, window_params = [{transform_indices = @transform_0, window_bounds = array<i64: 8, 256>}, {transform_indices = @transform_1, window_bounds = array<i64: 2, 256>}, {transform_indices = @transform_2, window_bounds = array<i64: 1, 24, 24>}]} {
    %c0_i32 = arith.constant 0 : i32
    %0 = arith.cmpi eq, %arg1, %c0_i32 : i32
    %1 = arith.extui %0 : i1 to i32
    %c0_i32_0 = arith.constant 0 : i32
    %2 = arith.cmpi ne, %1, %c0_i32_0 : i32
    scf.if %2 {
      %cst_11 = arith.constant 0.000000e+00 : f32
      %20 = vector.broadcast %cst_11 : f32 to vector<24x24xf32>
      %c0_12 = arith.constant 0 : index
      %c0_13 = arith.constant 0 : index
      %21 = vector.load %arg5[%c0_12, %c0_13] : memref<24x24xf32, #tpu.memory_space<vmem>>, vector<24x24xf32>
      tpu.vector_store %arg5[%c0_12, %c0_13], %20 {strides = array<i32>} : memref<24x24xf32, #tpu.memory_space<vmem>>, vector<24x24xf32>,
    } else {
    }
    %c0 = arith.constant 0 : index
    %c0_1 = arith.constant 0 : index
    %3 = vector.load %arg2[%c0, %c0_1] : memref<8x256xf32, #tpu.memory_space<vmem>>, vector<8x256xf32>
    %c0_2 = arith.constant 0 : index
    %c0_3 = arith.constant 0 : index
    %4 = vector.load %arg3[%c0_2, %c0_3] : memref<2x256xf32, #tpu.memory_space<vmem>>, vector<1x256xf32>
    %c1 = arith.constant 1 : index
    %c0_4 = arith.constant 0 : index
    %5 = vector.load %arg3[%c1, %c0_4] : memref<2x256xf32, #tpu.memory_space<vmem>>, vector<1x256xf32>
    %6 = vector.broadcast %4 : vector<1x256xf32> to vector<8x256xf32>
    %7 = arith.mulf %3, %6 : vector<8x256xf32>
    %8 = vector.broadcast %5 : vector<1x256xf32> to vector<8x256xf32>
    %9 = arith.mulf %3, %8 : vector<8x256xf32>
    %10 = arith.subf %9, %7 : vector<8x256xf32>
    %11 = arith.subf %3, %9 : vector<8x256xf32>
    %12 = tpu.concatenate %7, %10, %11 in 0 : vector<8x256xf32>, vector<8x256xf32>, vector<8x256xf32> -> vector<24x256xf32>
    %c0_5 = arith.constant 0 : index
    %c0_6 = arith.constant 0 : index
    %13 = vector.load %arg5[%c0_5, %c0_6] : memref<24x24xf32, #tpu.memory_space<vmem>>, vector<24x24xf32>
    %cst = arith.constant dense<0.000000e+00> : vector<24x24xf32>
    %14 = tpu.matmul %12, %12, %cst {dimension_numbers = #tpu.dot_dimension_numbers<[1], [1], [0], [0], [0, 0, 1, 0], [], []>} : vector<24x256xf32>, vector<24x256xf32>, vector<24x24xf32> -> vector<24x24xf32>
    %15 = arith.addf %13, %14 : vector<24x24xf32>
    %c0_7 = arith.constant 0 : index
    %c0_8 = arith.constant 0 : index
    %16 = vector.load %arg5[%c0_7, %c0_8] : memref<24x24xf32, #tpu.memory_space<vmem>>, vector<24x24xf32>
    tpu.vector_store %arg5[%c0_7, %c0_8], %15 {strides = array<i32>} : memref<24x24xf32, #tpu.memory_space<vmem>>, vector<24x24xf32>,
    %c0_i32_9 = arith.constant 0 : i32
    %17 = arith.cmpi eq, %arg1, %c0_i32_9 : i32
    %18 = arith.extui %17 : i1 to i32
    %c0_i32_10 = arith.constant 0 : i32
    %19 = arith.cmpi ne, %18, %c0_i32_10 : i32
    scf.if %19 {
      %c0_11 = arith.constant 0 : index
      %c0_12 = arith.constant 0 : index
      %20 = vector.load %arg5[%c0_11, %c0_12] : memref<24x24xf32, #tpu.memory_space<vmem>>, vector<24x24xf32>
      %c0_13 = arith.constant 0 : index
      %c0_14 = arith.constant 0 : index
      %c0_15 = arith.constant 0 : index
      %21 = vector.load %arg4[%c0_13, %c0_14, %c0_15] : memref<1x24x24xf32, #tpu.memory_space<vmem>>, vector<1x24x24xf32>
      %22 = vector.shape_cast %21 : vector<1x24x24xf32> to vector<24x24xf32>
      %23 = vector.shape_cast %20 : vector<24x24xf32> to vector<1x24x24xf32>
      tpu.vector_store %arg4[%c0_13, %c0_14, %c0_15], %23 {strides = array<i32>} : memref<1x24x24xf32, #tpu.memory_space<vmem>>, vector<1x24x24xf32>,
    } else {
    }
    return
  }
  func.func @transform_0(%arg0: i32, %arg1: i32) -> (i32, i32) {
    %c1_i32 = arith.constant 1 : i32
    %0 = arith.muli %arg0, %c1_i32 : i32
    %1 = arith.addi %0, %arg1 : i32
    %c0_i32 = arith.constant 0 : i32
    %c0_i32_0 = arith.constant 0 : i32
    return %c0_i32, %1 : i32, i32
  }
  func.func @transform_1(%arg0: i32, %arg1: i32) -> (i32, i32) {
    %c1_i32 = arith.constant 1 : i32
    %0 = arith.muli %arg0, %c1_i32 : i32
    %1 = arith.addi %0, %arg1 : i32
    %c0_i32 = arith.constant 0 : i32
    %c0_i32_0 = arith.constant 0 : i32
    return %c0_i32, %1 : i32, i32
  }
  func.func @transform_2(%arg0: i32, %arg1: i32) -> (i32, i32, i32) {
    %c0_i32 = arith.constant 0 : i32
    %c0_i32_0 = arith.constant 0 : i32
    %c0_i32_1 = arith.constant 0 : i32
    return %arg0, %c0_i32, %c0_i32_0 : i32, i32, i32
  }
}

</mosaic_0001>

<bundles_post_ra>
// kernel: tpu_custom_call.1
= control target key start
LH: loop header
LB: loop body
LE: loop exit
PB: predicated region body
PF: predicated region fallthrough
CT: control target
= control target key end

     0   :  { %7 = vsyncpa [#allocation4], 0  ;;  %s325_s0 = inlined_call_operand.hbm [shape: f32[8,256], index: 0, kind: input, shape index: {}]   ;;  %s326_s1 = inlined_call_operand.hbm [shape: f32[2,256], index: 1, kind: input, shape index: {}]   ;;  %s327_s2 = inlined_call_operand.hbm [shape: f32[1,24,24], index: 2, kind: output, shape index: {}]  }
   0x1   :  { %8 = vsyncpa [#allocation7], 0 }
   0x2   :  { %9 = vsyncpa [#allocation5], 0  ;;  %s286_s9 = smov [#allocation3]   ;;  %s287_s11 = smov [#allocation6]  }
   0x3   :  { %s20_s10 = sshll.u32 %s286_s9, 4  ;;  %s34_s12 = sshll.u32 %s287_s11, 4  ;;  %s21_s10 = int_to_ptr.vmem [resolvable:$true] %s20_s10  ;;  %s35_s12 = int_to_ptr.vmem [resolvable:$true] %s34_s12 }
   0x4   :  { %s228_s13 = scalar_lea.vmem %s21_s10, 256  ;;  %p233_p1 = scmp.lt.s32.totalorder %s21_s10, %s21_s10 }
   0x5   :  { %p229_p0 = scmp.ne.s32.totalorder %s21_s10, %s228_s13  ;;  %p234_p2 = scmp.lt.s32.totalorder %s228_s13, %s228_s13 }
   0x7   :  { %p235_p3 = por %p234_p2, %p233_p1 }
   0x9   :  { %p236_p4 = pnand %p235_p3, %p229_p0 }
   0xb   :  { %239 = shalt.err (!%p236_p4)
}
   0xc   :  { %23 = dma.hbm_to_vmem [thread:$0]  %s325_s0, 256, %s21_s10, [#allocation4]  }
   0xd   :  { %s248_s16 = scalar_lea.vmem %s35_s12, 64  ;;  %p253_p6 = scmp.lt.s32.totalorder %s35_s12, %s35_s12 }
   0xe   :  { %p249_p5 = scmp.ne.s32.totalorder %s35_s12, %s248_s16  ;;  %p254_p7 = scmp.lt.s32.totalorder %s248_s16, %s248_s16 }
  0x10   :  { %p255_p8 = por %p254_p7, %p253_p6 }
  0x12   :  { %p256_p9 = pnand %p255_p8, %p249_p5 }
  0x14   :  { %259 = shalt.err (!%p256_p9)
}
  0x15   :  { %37 = dma.hbm_to_vmem [thread:$0]  %s326_s1, 64, %s35_s12, [#allocation7]  }
  0x16   :  { %280 = dma.done.wait [#allocation4], 256  }
  0x17   :  { %281 = vsyncadd [#allocation4], 4294967040 }
  0x18   :  { %282 = dma.done.wait [#allocation7], 64  }
  0x19   :  { %283 = vsyncadd [#allocation7], 4294967232  ;;  %v62_v0 = vlaneseq  ;;  %vm52_vm0 = vcmask 195584   ;;  %v288_v1 = vmov 0.0   ;;  %v57_v6 = vld [vmem:[#allocation3 + $0x8] sm:$0xff]  ;;  %v56_v9 = vld [vmem:[#allocation3] sm:$0xff] }
  0x1a   :  { %54 = vst.msk [vmem:[#allocation2 + $0x8] sm:$0xff] %vm52_vm0, %v288_v1  ;;  %53 = vst.msk [vmem:[#allocation2] sm:$0xff] %vm52_vm0, %v288_v1  ;;  %v58_v5 = vld [vmem:[#allocation6] ss:$2 sm:$0x3]  ;;  %s289_s0 = smov [#allocation8]  }
  0x1b   :  { %55 = vst.msk [vmem:[#allocation2 + $0x10] sm:$0xff] %vm52_vm0, %v288_v1  ;;  %v63_v2 = vshrl.u32 %v62_v0, 7  ;;  %v60_v7 = vld [vmem:[#allocation6 + $0x1] ss:$2 sm:$0x3]  ;;  %s195_s1 = sshll.u32 %s289_s0, 4  ;;  %s196_s1 = int_to_ptr.vmem [resolvable:$true] %s195_s1 }
  0x1c   :  { %s260_s19 = scalar_lea.vmem %s196_s1, 384  ;;  %p265_p11 = scmp.lt.s32.totalorder %s196_s1, %s196_s1 }
  0x1d   :  { %v68_v3 = vsub.s32 1, %v63_v2  ;;  %v64_v4 = vsub.s32 0, %v63_v2  ;;  %p261_p10 = scmp.ne.s32.totalorder %s196_s1, %s260_s19  ;;  %p266_p12 = scmp.lt.s32.totalorder %s260_s19, %s260_s19 }
  0x1f   :  { %v69_v8 = vrot.slane %v58_v5, %v68_v3  ;;  %v65_v10 = vrot.slane %v58_v5, %v64_v4  ;;  %v82_v11 = vrot.slane %v60_v7, %v68_v3  ;;  %v78_v12 = vrot.slane %v60_v7, %v64_v4  ;;  %p267_p13 = por %p266_p12, %p265_p11 }
  0x21   :  { %v73_v13 = vmul.f32 %v69_v8, %v57_v6  ;;  %v86_v14 = vmul.f32 %v82_v11, %v57_v6  ;;  %v85_v15 = vmul.f32 %v78_v12, %v56_v9  ;;  %v72_v16 = vmul.f32 %v65_v10, %v56_v9  ;;  %v92_v21 = vld [vmem:[#allocation2 + $0x8] sm:$0xff]  ;;  %v91_v22 = vld [vmem:[#allocation2] sm:$0xff]  ;;  %p268_p0 = pnand %p267_p13, %p261_p10 }
  0x22   :  { %v93_v29 = vld [vmem:[#allocation2 + $0x10] sm:$0xff] }
  0x23   :  { %158 = vmatprep.mubr.f32.mxu0 %v73_v13  ;;  %v90_v17 = vsub.f32 %v57_v6, %v86_v14  ;;  %v89_v18 = vsub.f32 %v56_v9, %v85_v15  ;;  %v88_v19 = vsub.f32 %v86_v14, %v73_v13  ;;  %v87_v20 = vsub.f32 %v85_v15, %v72_v16 }
  0x25   :  { %208 = vmatprep.subr.mxu1 %v90_v17  ;;  %120 = vmatprep.subr.mxu0 %v90_v17 }
  0x26   :  { %211 = vmatpush1.xpose.msra.mxu1 %v89_v18  ;;  %121 = vmatpush1.xpose.msra.mxu0 %v89_v18 }
  0x27   :  { %209 = vmatprep.subr.mxu1 %v88_v19  ;;  %122 = vmatprep.subr.mxu0 %v88_v19 }
  0x28   :  { %163 = vmatprep.mubr.f32.mxu1 %v88_v19 }
  0x2a   :  { %212 = vmatpush1.xpose.msra.mxu1 %v87_v20  ;;  %123 = vmatpush1.xpose.msra.mxu0 %v87_v20 }
  0x2b   :  { %210 = vmatprep.subr.mxu1 %v73_v13  ;;  %124 = vmatprep.subr.mxu0 %v73_v13 }
  0x2e   :  { %213 = vmatpush1.xpose.msra.mxu1 %v72_v16  ;;  %125 = vmatpush1.xpose.msra.mxu0 %v72_v16 }
  0x31   :  { %164 = vmatmul.mubr.f32.vlgmr.msra.gmra.mxu1 %v87_v20  ;;  %159 = vmatmul.mubr.f32.vlgmr.msra.gmra.mxu0 %v72_v16 }
  0x32   :  { %168 = vmatprep.mubr.f32.mxu1 %v90_v17 }
  0x35   :  { %169 = vmatmul.mubr.f32.gmra.mxu1 %v89_v18 }
  0xf1   :  { %v165_v23 = vpop.f32.mrf.mxu1  ;;  %v160_v24 = vpop.f32.mrf.mxu0 }
  0xf2   :  { %v175_v25 = vadd.f32 %v165_v23, %v92_v21  ;;  %v174_v26 = vadd.f32 %v160_v24, %v91_v22 }
  0xf3   :  { %v167_v27 = vpop.f32.mrf.mxu1  ;;  %v162_v28 = vpop.f32.mrf.mxu0 }
  0xf4   :  { %179 = vst.msk [vmem:[#allocation2 + $0x8] sm:$0xff] %vm52_vm0, %v175_v25  ;;  %178 = vst.msk [vmem:[#allocation2] sm:$0xff] %vm52_vm0, %v174_v26 }
  0xf5   :  { %v170_v30 = vpop.f32.mrf.mxu1 }
  0xf6   :  { %v176_v31 = vadd.f32 %v170_v30, %v93_v29 }
  0xf7   :  { %v172_v32 = vpop.f32.mrf.mxu1 }
  0xf8   :  { %180 = vst.msk [vmem:[#allocation2 + $0x10] sm:$0xff] %vm52_vm0, %v176_v31 }
  0xfb   :  { %v184_v33 = vld [vmem:[#allocation2] sm:$0xff]  ;;  %v185_v34 = vld [vmem:[#allocation2 + $0x8] sm:$0xff] }
  0xfc   :  { %187 = vst.msk [vmem:[#allocation8] sm:$0xff] %vm52_vm0, %v184_v33  ;;  %188 = vst.msk [vmem:[#allocation8 + $0x8] sm:$0xff] %vm52_vm0, %v185_v34 }
  0xff   :  { %v186_v35 = vld [vmem:[#allocation2 + $0x10] sm:$0xff] }
 0x100   :  { %189 = vst.msk [vmem:[#allocation8 + $0x10] sm:$0xff] %vm52_vm0, %v186_v35 }
 0x101   :  { %271 = shalt.err (!%p268_p0)
}
 0x102   :  { %s290_s20 = smov 128   ;;  %s291_s21 = smov 8  }
 0x103   :  { %201 = dma.vmem_to_hbm [thread:$0]  %s196_s1, 384, %s327_s2, [#allocation5], %s290_s20, %s290_s20, %s291_s21  }
 0x104   :  { %284 = dma.done.wait [#allocation5], 384  }
 0x105   :  { %285 = vsyncadd [#allocation5], 4294966912 }
 0x106   :  { %205 = vsyncpa [#allocation4], 1 }
 0x107   :  { %206 = vsyncpa [#allocation7], 1 }
 0x108   :  { %207 = vsyncpa [#allocation5], 1 }

</bundles_post_ra>
